<compile_context>
chip_gen: v7x
topology: tpu7x:2x2x1
jax: 0.10.0
libtpu: 0.0.40
codegen_flags: <defaults>
</compile_context>

<pallas_src>
import math

import jax
import jax.numpy as jnp
from jax.experimental import pallas as pl
from jax.experimental.pallas import tpu as pltpu


_PREFERRED_LANES = (512, 256, 128)   # lane-dense widths (multiples of 128)
_TARGET_BLOCK_BYTES = 4 << 20        # ~4 MiB per block (review: best on v7x)
_MIN_PALLAS_BYTES = 256 << 10        # below this, fused XLA multiply wins


def _sublane(dtype) -> int:
    # sublane multiple per dtype: 8 for 4-byte, 16 for 2-byte, 32 for 1-byte
    itemsize = jnp.dtype(dtype).itemsize
    return max(8, 32 // itemsize)


def _make_scale_kernel(scale: float):
    def kernel(x_ref, o_ref):
        # Weak-typed Python constant: multiply stays in the input dtype
        # (matches PyTorch `bf16_tensor * scalar_buffer -> bf16`).
        o_ref[...] = x_ref[...] * scale
    return kernel


def _const_scale_2d(x2d: jax.Array, scale: float) -> jax.Array:
    """Scale a lane-dense (m, C) slab with a tiled, pipelined Pallas kernel."""
    m, c = x2d.shape
    dtype = x2d.dtype
    itemsize = jnp.dtype(dtype).itemsize
    sub = _sublane(dtype)
    bytes_per_row = c * itemsize

    # Largest row-tile that keeps one block <= ~4 MiB (sublane-aligned).
    max_tile_m = max(sub, (_TARGET_BLOCK_BYTES // bytes_per_row) // sub * sub)

    # Target grid: at least 2 and even, so the "parallel" axis splits evenly
    # across v7x's two TensorCores (harmless on 1-TC v5e/v6e).
    grid_m = pl.cdiv(m, max_tile_m)
    if m >= 2 * sub and grid_m % 2 == 1:
        grid_m += 1

    if grid_m <= 1:
        tile_m = m                      # full-extent block, single step
        grid_m = 1
    else:
        # Balance the blocks: ~m/grid rows each, rounded to the sublane.
        tile_m = ((pl.cdiv(m, grid_m) + sub - 1) // sub) * sub
        if tile_m >= m:                 # safety guard (tiny m)
            tile_m = m
            grid_m = 1
        else:
            grid_m = pl.cdiv(m, tile_m)

    block_bytes = tile_m * bytes_per_row
    # in + out, each double-buffered => 4x block bytes, plus headroom.
    vmem_limit = int(max(4 * block_bytes + (2 << 20), 16 << 20))

    return pl.pallas_call(
        _make_scale_kernel(scale),
        out_shape=jax.ShapeDtypeStruct((m, c), dtype),
        grid=(grid_m,),
        in_specs=[pl.BlockSpec((tile_m, c), lambda i: (i, 0))],
        out_specs=pl.BlockSpec((tile_m, c), lambda i: (i, 0)),
        compiler_params=pltpu.CompilerParams(
            dimension_semantics=("parallel",),
            vmem_limit_bytes=vmem_limit,
        ),
        cost_estimate=pl.CostEstimate(
            flops=m * c,
            transcendentals=0,
            bytes_accessed=2 * m * c * itemsize,
        ),
    )(x2d)


def const_scale(x: jax.Array, scale: float, *, force_pallas: bool = False) -> jax.Array:
    """Elementwise multiply by a constant scale (ConstScaleLayer.forward)."""
    orig_shape = x.shape
    n = math.prod(orig_shape)
    if n == 0:
        return x
    nbytes = n * jnp.dtype(x.dtype).itemsize

    # Small inputs: a standalone custom call cannot beat a fused XLA multiply
    # (and Pallas would block fusion with neighbouring ops).
    if not force_pallas and nbytes < _MIN_PALLAS_BYTES:
        return x * scale

    # Pick the widest lane count that divides numel (copy-free reshape).
    c = None
    for cand in _PREFERRED_LANES:
        if n % cand == 0:
            c = cand
            break
    if c is None:
        # numel not a multiple of 128: plain XLA multiply moves exactly 2N
        # bytes (optimal); avoids the old slice + concat extra HBM passes.
        return x * scale

    y2d = _const_scale_2d(x.reshape(n // c, c), scale)
    return y2d.reshape(orig_shape)


if __name__ == "__main__":
    key = jax.random.PRNGKey(0)
    k1, k2, k3, k4 = jax.random.split(key, 4)
    scale = 2.5  # fixed "buffer" value from __init__(scale=2.5)

    # 1) Small NCHW feature map: default path is the XLA fallback; also force
    #    the Pallas kernel once (single full-extent block) for correctness.
    x1 = jax.random.normal(k1, (2, 4, 16, 16), dtype=jnp.float32)
    y1 = jax.block_until_ready(const_scale(x1, scale))
    y1p = jax.block_until_ready(const_scale(x1, scale, force_pallas=True))
    assert y1.shape == x1.shape and y1.dtype == x1.dtype
    assert jnp.allclose(y1, x1 * scale, atol=1e-6, rtol=1e-6)
    assert jnp.allclose(y1p, x1 * scale, atol=1e-6, rtol=1e-6)

    # 2) Larger input exercising the tiled, balanced 2-block path
    #    (numel = 307200 -> m = 600 rows of 512 lanes, blocks of 304 / 296).
    x2 = jax.random.normal(k2, (3, 16, 80, 80), dtype=jnp.float32)
    y2 = jax.block_until_ready(const_scale(x2, scale))
    assert jnp.allclose(y2, x2 * scale, atol=1e-6, rtol=1e-6)

    # 3) Non-128-aligned numel: XLA fallback (no extra HBM passes).
    x3 = jax.random.normal(k3, (5, 7, 11), dtype=jnp.float32)
    y3 = jax.block_until_ready(const_scale(x3, scale))
    assert jnp.allclose(y3, x3 * scale, atol=1e-6, rtol=1e-6)

    # 4) bf16 input through the Pallas kernel: scale stays a weak-typed
    #    constant, output stays bf16.
    x4 = jax.random.normal(k4, (2, 8, 16, 16), dtype=jnp.bfloat16)
    y4 = jax.block_until_ready(const_scale(x4, scale, force_pallas=True))
    assert y4.dtype == jnp.bfloat16
    assert jnp.allclose(y4.astype(jnp.float32),
                        (x4 * scale).astype(jnp.float32), atol=1e-2, rtol=1e-2)

    print("KERNEL_OK")
</pallas_src>

<mosaic_0001>
module attributes {stable_mosaic.version = 11 : i64} {
  func.func @kernel(%arg0: i32, %arg1: memref<4x512xf32, #tpu.memory_space<vmem>>, %arg2: memref<4x512xf32, #tpu.memory_space<vmem>>) attributes {dimension_semantics = [#tpu.dimension_semantics<parallel>], iteration_bounds = array<i64: 1>, scalar_prefetch = 0 : i64, scratch_operands = 0 : i64, tpu.core_type = #tpu.core_type<tc>, window_params = [{transform_indices = @transform_0, window_bounds = array<i64: 4, 512>}, {transform_indices = @transform_1, window_bounds = array<i64: 4, 512>}]} {
    %c0 = arith.constant 0 : index
    %c0_0 = arith.constant 0 : index
    %0 = vector.load %arg1[%c0, %c0_0] : memref<4x512xf32, #tpu.memory_space<vmem>>, vector<4x512xf32>
    %cst = arith.constant 2.500000e+00 : f32
    %1 = vector.broadcast %cst : f32 to vector<4x512xf32>
    %2 = arith.mulf %0, %1 : vector<4x512xf32>
    %c0_1 = arith.constant 0 : index
    %c0_2 = arith.constant 0 : index
    %3 = vector.load %arg2[%c0_1, %c0_2] : memref<4x512xf32, #tpu.memory_space<vmem>>, vector<4x512xf32>
    tpu.vector_store %arg2[%c0_1, %c0_2], %2 {strides = array<i32>} : memref<4x512xf32, #tpu.memory_space<vmem>>, vector<4x512xf32>,
    return
  }
  func.func @transform_0(%arg0: i32) -> (i32, i32) {
    %c0_i32 = arith.constant 0 : i32
    %c0_i32_0 = arith.constant 0 : i32
    return %arg0, %c0_i32 : i32, i32
  }
  func.func @transform_1(%arg0: i32) -> (i32, i32) {
    %c0_i32 = arith.constant 0 : i32
    %c0_i32_0 = arith.constant 0 : i32
    return %arg0, %c0_i32 : i32, i32
  }
}

</mosaic_0001>

<bundles_post_ra>
// kernel: tpu_custom_call.1
= control target key start
LH: loop header
LB: loop body
LE: loop exit
PB: predicated region body
PF: predicated region fallthrough
CT: control target
= control target key end

     0   :  { %6 = vsyncpa [#allocation3], 0  ;;  %s128_s0 = inlined_call_operand.hbm [shape: f32[4,512], index: 0, kind: input, shape index: {}]   ;;  %s129_s1 = inlined_call_operand.hbm [shape: f32[4,512], index: 1, kind: output, shape index: {}]  }
   0x1   :  { %7 = vsyncpa [#allocation4], 0  ;;  %s92_s6 = smov [#allocation2]   ;;  %s44_s10 = scalar_lea.hbm %s128_s0, 256 }
   0x2   :  { %s14_s7 = sshll.u32 %s92_s6, 4  ;;  %p45_p0 = scmp.ne.s32.totalorder %s128_s0, %s44_s10  ;;  %s15_s7 = int_to_ptr.vmem [resolvable:$true] %s14_s7 }
   0x3   :  { %p48_p1 = scmp.lt.u32.totalorder %s44_s10, %s128_s0 }
   0x5   :  { %p50_p2 = pnand %p48_p1, %p45_p0 }
   0x7   :  { %53 = shalt.err (!%p50_p2)
}
   0x8   :  { %s54_s15 = scalar_lea.vmem %s15_s7, 256  ;;  %p59_p4 = scmp.lt.s32.totalorder %s15_s7, %s15_s7 }
   0x9   :  { %p55_p3 = scmp.ne.s32.totalorder %s15_s7, %s54_s15  ;;  %p60_p5 = scmp.lt.s32.totalorder %s54_s15, %s54_s15 }
   0xb   :  { %p61_p6 = por %p60_p5, %p59_p4 }
   0xd   :  { %p62_p7 = pnand %p61_p6, %p55_p3 }
   0xf   :  { %65 = shalt.err (!%p62_p7)
}
  0x10   :  { %17 = dma.hbm_to_vmem [thread:$0]  %s128_s0, 256, %s15_s7, [#allocation3]  }
  0x11   :  { %88 = dma.done.wait [#allocation3], 256  }
  0x12   :  { %89 = vsyncadd [#allocation3], 4294967040  ;;  %s93_s18 = smov [#allocation5]   ;;  %v21_v0 = vld [vmem:[#allocation2] sm:$0xff]  ;;  %v22_v1 = vld [vmem:[#allocation2 + $0x8] sm:$0xff] }
  0x13   :  { %s33_s19 = sshll.u32 %s93_s18, 4  ;;  %v23_v2 = vmul.f32 2.5, %v21_v0  ;;  %v24_v3 = vmul.f32 2.5, %v22_v1  ;;  %s34_s19 = int_to_ptr.vmem [resolvable:$true] %s33_s19 }
  0x14   :  { %s66_s20 = scalar_lea.vmem %s34_s19, 256  ;;  %p71_p9 = scmp.lt.s32.totalorder %s34_s19, %s34_s19 }
  0x15   :  { %25 = vst [vmem:[#allocation5] sm:$0xff] %v23_v2  ;;  %26 = vst [vmem:[#allocation5 + $0x8] sm:$0xff] %v24_v3  ;;  %p67_p8 = scmp.ne.s32.totalorder %s34_s19, %s66_s20  ;;  %p72_p10 = scmp.lt.s32.totalorder %s66_s20, %s66_s20 }
  0x17   :  { %p73_p11 = por %p72_p10, %p71_p9 }
  0x19   :  { %p74_p12 = pnand %p73_p11, %p67_p8 }
  0x1b   :  { %77 = shalt.err (!%p74_p12)
}
  0x1c   :  { %s78_s22 = scalar_lea.hbm %s129_s1, 256 }
  0x1d   :  { %p79_p13 = scmp.ne.s32.totalorder %s129_s1, %s78_s22  ;;  %p82_p0 = scmp.lt.u32.totalorder %s78_s22, %s129_s1 }
  0x1f   :  { %p84_p1 = pnand %p82_p0, %p79_p13 }
  0x21   :  { %87 = shalt.err (!%p84_p1)
}
  0x22   :  { %36 = dma.vmem_to_hbm [thread:$0]  %s34_s19, 256, %s129_s1, [#allocation4]  }
  0x23   :  { %90 = dma.done.wait [#allocation4], 256  }
  0x24   :  { %91 = vsyncadd [#allocation4], 4294967040 }
  0x25   :  { %40 = vsyncpa [#allocation3], 1 }
  0x26   :  { %41 = vsyncpa [#allocation4], 1 }

</bundles_post_ra>
